<compile_context>
chip_gen: v7x
topology: tpu7x:2x2x1
jax: 0.10.0
libtpu: 0.0.40
codegen_flags: <defaults>
</compile_context>

<pallas_src>
import math

import numpy as np
import jax
import jax.numpy as jnp
from jax.experimental import pallas as pl
from jax.experimental.pallas import tpu as pltpu

# ---------------- synthetic model configuration ----------------
INPUT_LAYER_NAMES = ["alliedUnits", "enemyUnits", "heightMap"]
IN_LAYERS = [0, 1]                     # indices of input layers
OUT_LAYERS = [0, 1]                    # indices of target layers
HEIGHT_MAP_IDX = INPUT_LAYER_NAMES.index("heightMap")
HISTORY_LEN = 4
FUTURE_LEN = 9 - HISTORY_LEN           # = 5
HIDDEN_CHS = [8, 16, 32, 64]           # kernel below is specialized to this 4-level U-Net
IN_CH = HISTORY_LEN * len(IN_LAYERS) + 1   # +1 heightmap channel
OUT_CH = FUTURE_LEN * len(OUT_LAYERS)      # = 10
OUT_PAD = ((OUT_CH + 7) // 8) * 8          # = 16, padded so the final store is unmasked

# TODO(synk): training-mode deep-supervision aux heads and the disable_residule=True
# (logit) branch are not exercised by this eval forward and are not implemented.


# ---------------- pltpu.roll convention probe (run once, eagerly) ----------------
_ROLL_NP_CONVENTION = None


def _roll_is_np_convention():
    """Probe whether pltpu.roll follows np.roll semantics (out[i] = in[(i - shift) % n])."""
    global _ROLL_NP_CONVENTION
    if _ROLL_NP_CONVENTION is None:
        def _k(x_ref, o_ref):
            o_ref[...] = pltpu.roll(x_ref[...], 1, axis=1)

        x = np.tile(np.arange(128, dtype=np.float32), (8, 1))
        y = np.asarray(
            pl.pallas_call(_k, out_shape=jax.ShapeDtypeStruct((8, 128), jnp.float32))(
                jnp.asarray(x)))
        if np.array_equal(y, np.roll(x, 1, axis=1)):
            _ROLL_NP_CONVENTION = True
        elif np.array_equal(y, np.roll(x, -1, axis=1)):
            _ROLL_NP_CONVENTION = False
        else:
            raise RuntimeError("unexpected pltpu.roll semantics")
    return _ROLL_NP_CONVENTION


# ---------------- host-built constants ----------------
def _make_masks(H, W):
    """mask[t, 0, p] = 1 iff the 3x3 tap t (dy,dx) reads an in-bounds pixel for output p."""
    HW = H * W
    m = np.zeros((9, 1, HW), np.float32)
    for t in range(9):
        dy, dx = t // 3 - 1, t % 3 - 1
        for i in range(H):
            for j in range(W):
                if 0 <= i + dy < H and 0 <= j + dx < W:
                    m[t, 0, i * W + j] = 1.0
    return m


def _make_shifts(H, W, np_convention):
    """Static lane-roll amounts so that rolled[p] = x[p + dy*W + dx] (then masked)."""
    HW = H * W
    shifts = []
    for t in range(9):
        dy, dx = t // 3 - 1, t % 3 - 1
        s = dy * W + dx
        shifts.append(((-s) % HW) if np_convention else (s % HW))
    return tuple(shifts)


def _make_subsample(H, W):
    """sub[h*W+w, i*Wo+j] = 1 iff (h,w) == (2i,2j): stride-2 pixel selection matrix."""
    Ho, Wo = H // 2, W // 2
    sub = np.zeros((H * W, Ho * Wo), np.float32)
    for i in range(Ho):
        for j in range(Wo):
            sub[(2 * i) * W + (2 * j), i * Wo + j] = 1.0
    return sub


def _make_sel(H, W, stride):
    """sel[t, h*W+w, i*Wo+j] = 1 iff input pixel (h,w) feeds output (i,j) for 3x3 tap t
    (padding=1, given stride).  Used only at the small 8x8 / 4x4 / 2x2 levels."""
    Ho, Wo = H // stride, W // stride
    sel = np.zeros((9, H * W, Ho * Wo), np.float32)
    for t in range(9):
        dy, dx = t // 3 - 1, t % 3 - 1
        for i in range(Ho):
            for j in range(Wo):
                h, w = stride * i + dy, stride * j + dx
                if 0 <= h < H and 0 <= w < W:
                    sel[t, h * W + w, i * Wo + j] = 1.0
    return sel


def _make_ups(Hi, Wi):
    """ups[t, i*Wi+j, (2i+a)*Wo+(2j+b)] = 1 with t = a*2+b  (ConvTranspose2d k=2, s=2)."""
    Ho, Wo = 2 * Hi, 2 * Wi
    ups = np.zeros((4, Hi * Wi, Ho * Wo), np.float32)
    for t in range(4):
        a, b = t // 2, t % 2
        for i in range(Hi):
            for j in range(Wi):
                ups[t, i * Wi + j, (2 * i + a) * Wo + (2 * j + b)] = 1.0
    return ups


def build_aux(H, W):
    """Constant arrays in the exact order the kernel unpacks them."""
    assert H % 8 == 0 and W % 8 == 0, "need 3 stride-2 levels"
    masks16 = jnp.asarray(_make_masks(H, W), jnp.float32)                    # (9,1,HW)
    sub16 = jnp.asarray(_make_subsample(H, W), jnp.bfloat16)                 # (HW, HW/4)
    sel_s1 = [jnp.asarray(_make_sel(H // f, W // f, 1), jnp.bfloat16) for f in (2, 4, 8)]
    sel_s2 = [jnp.asarray(_make_sel(H // f, W // f, 2), jnp.bfloat16) for f in (2, 4)]
    ups = [jnp.asarray(_make_ups(H // f, W // f), jnp.bfloat16) for f in (8, 4, 2)]
    return [masks16, sub16] + sel_s1 + sel_s2 + ups


# ---------------- in-kernel building blocks ----------------
def _conv3x3_roll(x, masks_ref, w_ref, shifts, b_ref=None):
    """3x3 stride-1 conv at a lane-friendly resolution.  x: (Cin, HW) f32.
    Per tap: XLU lane roll + border mask, then a bf16 MXU weight matmul (f32 acc)."""
    acc = None
    for t in range(9):
        if shifts[t] == 0:
            xt = x.astype(jnp.bfloat16)                        # centre tap: no shift, no mask
        else:
            xt = (pltpu.roll(x, shifts[t], axis=1) * masks_ref[t]).astype(jnp.bfloat16)
        term = jnp.dot(w_ref[t], xt, preferred_element_type=jnp.float32)
        acc = term if acc is None else acc + term
    if b_ref is not None:
        acc = acc + b_ref[...]
    return acc


def _conv3x3_gather(x, sel_ref, w_ref, b_ref=None):
    """3x3 conv via per-tap gather matmuls (only used at the tiny 8x8/4x4/2x2 levels)."""
    xb = x.astype(jnp.bfloat16)
    hw_in, hw_out = sel_ref.shape[1], sel_ref.shape[2]
    acc = None
    for t in range(9):
        if t == 4 and hw_in == hw_out:
            xt = xb                                            # centre tap of a stride-1 conv
        else:
            xt = jnp.dot(xb, sel_ref[t],
                         preferred_element_type=jnp.float32).astype(jnp.bfloat16)
        term = jnp.dot(w_ref[t], xt, preferred_element_type=jnp.float32)
        acc = term if acc is None else acc + term
    if b_ref is not None:
        acc = acc + b_ref[...]
    return acc


def _tconv2x2(x, ups_ref, tw_ref, tb_ref):
    """ConvTranspose2d(k=2, s=2): ONE stacked bf16 weight matmul, then 4 bf16 0/1 scatters."""
    cout = tb_ref.shape[0]
    y_all = jnp.dot(tw_ref[...], x.astype(jnp.bfloat16),
                    preferred_element_type=jnp.float32)        # (4*Cout, HWin) f32
    acc = None
    for t in range(4):
        yt = y_all[t * cout:(t + 1) * cout].astype(jnp.bfloat16)
        term = jnp.dot(yt, ups_ref[t], preferred_element_type=jnp.float32)
        acc = term if acc is None else acc + term
    return acc + tb_ref[...]


def _inorm(x, lrelu=True):
    """InstanceNorm2d (affine=False, eps=1e-5) + optional LeakyReLU(0.01); x: (C, HW) f32."""
    mean = jnp.mean(x, axis=1, keepdims=True)
    var = jnp.mean(jnp.square(x - mean), axis=1, keepdims=True)
    y = (x - mean) * jax.lax.rsqrt(var + 1e-5)
    if lrelu:
        y = jnp.where(y >= 0.0, y, 0.01 * y)
    return y


# ---------------- the fused whole-network kernel (factory) ----------------
def _make_unet_kernel(btile, shifts):
    def kernel(
        x_ref, last_ref,
        m16_ref, sub_ref,                          # 16x16 tap masks, 16->8 subsample matrix
        s1b_ref, s1c_ref, s1d_ref,                 # stride-1 sel @ 8x8, 4x4, 2x2
        s2b_ref, s2c_ref,                          # stride-2 sel 8->4, 4->2
        upa_ref, upb_ref, upc_ref,                 # transpose-conv scatters 2->4, 4->8, 8->16
        in_w1, in_w2,
        d1_w1, d1_b1, d1_w2, d1_b2,
        d2_w1, d2_b1, d2_w2, d2_b2,
        bn_w1, bn_b1, bn_w2, bn_b2,
        u1_tw, u1_tb, u1_w1, u1_b1, u1_w2, u1_b2,
        u2_tw, u2_tb, u2_w1, u2_b1, u2_w2, u2_b2,
        u3_tw, u3_tb, u3_w1, u3_b1, u3_w2, u3_b2,
        pw_ref, pb_ref,
        out_ref,
    ):
        for b in range(btile):                     # statically unrolled: independent images
            x = x_ref[b]                           # (IN_CH, HW)   f32
            last = last_ref[b]                     # (OUT_PAD, HW) f32

            # input module: conv, conv, InstanceNorm (no LeakyReLU), no bias
            h = _conv3x3_roll(x, m16_ref, in_w1, shifts)
            h = _conv3x3_roll(h, m16_ref, in_w2, shifts)
            h = _inorm(h, lrelu=False)
            enc0 = h                               # (8, 256)

            # encoder level 1: stride-2 conv done at full res (roll+mask) then subsampled
            hf = _conv3x3_roll(h, m16_ref, d1_w1, shifts)                    # (16, 256)
            h = jnp.dot(hf.astype(jnp.bfloat16), sub_ref[...],
                        preferred_element_type=jnp.float32) + d1_b1[...]     # (16, 64)
            h = _inorm(h)
            h = _inorm(_conv3x3_gather(h, s1b_ref, d1_w2, d1_b2))
            enc1 = h                               # (16, 64)

            # encoder level 2
            h = _inorm(_conv3x3_gather(h, s2b_ref, d2_w1, d2_b1))            # (32, 16)
            h = _inorm(_conv3x3_gather(h, s1c_ref, d2_w2, d2_b2))
            enc2 = h

            # bottleneck
            h = _inorm(_conv3x3_gather(h, s2c_ref, bn_w1, bn_b1))            # (64, 4)
            h = _inorm(_conv3x3_gather(h, s1d_ref, bn_w2, bn_b2))

            # decoder
            h = _tconv2x2(h, upa_ref, u1_tw, u1_tb) + enc2                   # (32, 16)
            h = _inorm(_conv3x3_gather(h, s1c_ref, u1_w1, u1_b1))
            h = _inorm(_conv3x3_gather(h, s1c_ref, u1_w2, u1_b2))

            h = _tconv2x2(h, upb_ref, u2_tw, u2_tb) + enc1                   # (16, 64)
            h = _inorm(_conv3x3_gather(h, s1b_ref, u2_w1, u2_b1))
            h = _inorm(_conv3x3_gather(h, s1b_ref, u2_w2, u2_b2))

            h = _tconv2x2(h, upc_ref, u3_tw, u3_tb) + enc0                   # (8, 256)
            h = _inorm(_conv3x3_roll(h, m16_ref, u3_w1, shifts, u3_b1))
            h = _inorm(_conv3x3_roll(h, m16_ref, u3_w2, shifts, u3_b2))

            # 1x1 projection fused with residual head: clamp(last + tanh(residule), 0, 1)
            res = jnp.dot(pw_ref[...], h.astype(jnp.bfloat16),
                          preferred_element_type=jnp.float32) + pb_ref[...]  # (OUT_PAD, HW)
            out_ref[b] = jnp.clip(last + jnp.tanh(res), 0.0, 1.0)

    return kernel


# ---------------- parameters (packed per-tap layouts) ----------------
def init_params(key):
    ks = iter(jax.random.split(key, 48))

    def convw(cout, cin, taps=9):
        w = jax.random.normal(next(ks), (taps, cout, cin), jnp.float32) / math.sqrt(taps * cin)
        return w.astype(jnp.bfloat16)              # bf16 for the MXU

    def bias(c):
        return jax.random.normal(next(ks), (c, 1), jnp.float32) * 0.01

    C = HIDDEN_CHS
    p = {"in_w1": convw(C[0], IN_CH), "in_w2": convw(C[0], C[0]), "down": [], "up": []}
    for cin, cout in zip(C[:-2], C[1:]):
        p["down"].append(dict(w1=convw(cout, cin), b1=bias(cout),
                              w2=convw(cout, cout), b2=bias(cout)))
    p["bottleneck"] = dict(w1=convw(C[-1], C[-2]), b1=bias(C[-1]),
                           w2=convw(C[-1], C[-1]), b2=bias(C[-1]))
    for up_c, skip_c in zip(reversed(C[1:]), reversed(C[:-1])):
        p["up"].append(dict(tw=convw(skip_c, up_c, taps=4), tb=bias(skip_c),
                            w1=convw(skip_c, skip_c), b1=bias(skip_c),
                            w2=convw(skip_c, skip_c), b2=bias(skip_c)))
    p["proj_w"] = (jax.random.normal(next(ks), (OUT_CH, C[0]), jnp.float32)
                   / math.sqrt(C[0])).astype(jnp.bfloat16)
    p["proj_b"] = bias(OUT_CH)
    return p


def flatten_params(p):
    flat = [p["in_w1"], p["in_w2"]]
    for blk in p["down"]:
        flat += [blk["w1"], blk["b1"], blk["w2"], blk["b2"]]
    flat += [p["bottleneck"]["w1"], p["bottleneck"]["b1"],
             p["bottleneck"]["w2"], p["bottleneck"]["b2"]]
    for blk in p["up"]:
        tw = blk["tw"]                                            # (4, Cout, Cin)
        tw_flat = tw.reshape(tw.shape[0] * tw.shape[1], tw.shape[2])  # (4*Cout, Cin) stacked
        flat += [tw_flat, blk["tb"], blk["w1"], blk["b1"], blk["w2"], blk["b2"]]
    # pad the projection to OUT_PAD rows (zero rows -> zero residual -> clamp(0)=0)
    pw = jnp.zeros((OUT_PAD, p["proj_w"].shape[1]), p["proj_w"].dtype).at[:OUT_CH].set(p["proj_w"])
    pb = jnp.zeros((OUT_PAD, 1), jnp.float32).at[:OUT_CH].set(p["proj_b"])
    flat += [pw, pb]
    return flat


# ---------------- forward pass (one pallas_call) ----------------
def residule_unet_forward(minimaps, params, aux, btile=2):
    B, T, L, H, W = minimaps.shape
    HW = H * W

    # --- input assembly (matches ResiduleUnet.forward) ---
    x = minimaps[:, :HISTORY_LEN, jnp.array(IN_LAYERS)]
    x = x.reshape(B, HISTORY_LEN * len(IN_LAYERS), H, W)
    hm = (minimaps[:, 0, HEIGHT_MAP_IDX:HEIGHT_MAP_IDX + 1] - 127.0) / 128.0
    x = jnp.concatenate([x, hm], axis=1).reshape(B, IN_CH, HW).astype(jnp.float32)

    last = minimaps[:, HISTORY_LEN - 1, jnp.array(OUT_LAYERS)]
    last = last.reshape(B, len(OUT_LAYERS), HW).astype(jnp.float32)
    # F.interpolate to the same size is identity; pre-tile over future steps (channel = f*2+l),
    # then pad channels 10 -> 16 so the kernel's output block is sublane-unmasked.
    last_rep = jnp.tile(last, (1, FUTURE_LEN, 1))
    last_rep = jnp.pad(last_rep, ((0, 0), (0, OUT_PAD - OUT_CH), (0, 0)))

    # pad batch to a multiple of the per-grid-step batch tile
    Bp = -(-B // btile) * btile
    if Bp != B:
        x = jnp.pad(x, ((0, Bp - B), (0, 0), (0, 0)))
        last_rep = jnp.pad(last_rep, ((0, Bp - B), (0, 0), (0, 0)))

    shifts = _make_shifts(H, W, _roll_is_np_convention())
    kernel = _make_unet_kernel(btile, shifts)

    flat = [x, last_rep] + list(aux) + flatten_params(params)

    def batched_spec(a):
        return pl.BlockSpec((btile,) + a.shape[1:], lambda g: (g, 0, 0))

    def const_spec(a):
        z = (0,) * a.ndim
        return pl.BlockSpec(a.shape, lambda g, _z=z: _z)

    in_specs = [batched_spec(x), batched_spec(last_rep)] + [const_spec(a) for a in flat[2:]]

    out = pl.pallas_call(
        kernel,
        out_shape=jax.ShapeDtypeStruct((Bp, OUT_PAD, HW), jnp.float32),
        grid=(Bp // btile,),
        in_specs=in_specs,
        out_specs=pl.BlockSpec((btile, OUT_PAD, HW), lambda g: (g, 0, 0)),
        compiler_params=pltpu.CompilerParams(
            # "parallel" lets megacore parts split the batch-tile grid; on v7x this axis can
            # additionally be marked pltpu.CORE_PARALLEL for an explicit 2-TensorCore split.
            dimension_semantics=("parallel",),
            vmem_limit_bytes=16 * 1024 * 1024,     # total resident footprint is ~3 MiB
        ),
    )(*flat)
    out = out[:B, :OUT_CH]
    return out.reshape(B, FUTURE_LEN, len(OUT_LAYERS), H, W)


# ---------------- pure-JAX reference (same bf16 matmul / f32 norm math) ----------------
def _conv_ref(x, w_packed, b, stride):
    cout, cin = w_packed.shape[1], w_packed.shape[2]
    w = jnp.transpose(w_packed, (1, 2, 0)).reshape(cout, cin, 3, 3)          # OIHW
    y = jax.lax.conv_general_dilated(
        x.astype(jnp.bfloat16), w.astype(jnp.bfloat16),
        window_strides=(stride, stride), padding=((1, 1), (1, 1)),
        dimension_numbers=("NCHW", "OIHW", "NCHW"),
        preferred_element_type=jnp.float32)
    return y if b is None else y + b.reshape(1, cout, 1, 1)


def _inorm_ref(x, lrelu=True):
    mean = jnp.mean(x, axis=(2, 3), keepdims=True)
    var = jnp.mean(jnp.square(x - mean), axis=(2, 3), keepdims=True)
    y = (x - mean) * jax.lax.rsqrt(var + 1e-5)
    return jnp.where(y >= 0.0, y, 0.01 * y) if lrelu else y


def _tconv_ref(x, tw, tb):
    N, cin, Hi, Wi = x.shape
    cout = tw.shape[1]
    y = jnp.einsum("toc,nchw->ntohw", tw.astype(jnp.bfloat16), x.astype(jnp.bfloat16),
                   preferred_element_type=jnp.float32)
    y = y.reshape(N, 2, 2, cout, Hi, Wi)
    y = jnp.transpose(y, (0, 3, 4, 1, 5, 2)).reshape(N, cout, 2 * Hi, 2 * Wi)
    return y + tb.reshape(1, cout, 1, 1)


def reference_forward(minimaps, p):
    B, T, L, H, W = minimaps.shape
    x = minimaps[:, :HISTORY_LEN, jnp.array(IN_LAYERS)]
    x = x.reshape(B, HISTORY_LEN * len(IN_LAYERS), H, W)
    hm = (minimaps[:, 0, HEIGHT_MAP_IDX:HEIGHT_MAP_IDX + 1] - 127.0) / 128.0
    x = jnp.concatenate([x, hm], axis=1).astype(jnp.float32)

    h = _conv_ref(x, p["in_w1"], None, 1)
    h = _conv_ref(h, p["in_w2"], None, 1)
    h = _inorm_ref(h, lrelu=False)
    enc = [h]
    for blk in p["down"]:
        h = _inorm_ref(_conv_ref(h, blk["w1"], blk["b1"], 2))
        h = _inorm_ref(_conv_ref(h, blk["w2"], blk["b2"], 1))
        enc.append(h)
    h = _inorm_ref(_conv_ref(h, p["bottleneck"]["w1"], p["bottleneck"]["b1"], 2))
    h = _inorm_ref(_conv_ref(h, p["bottleneck"]["w2"], p["bottleneck"]["b2"], 1))
    for blk, skip in zip(p["up"], reversed(enc)):
        h = _tconv_ref(h, blk["tw"], blk["tb"]) + skip
        h = _inorm_ref(_conv_ref(h, blk["w1"], blk["b1"], 1))
        h = _inorm_ref(_conv_ref(h, blk["w2"], blk["b2"], 1))
    res = jnp.einsum("oc,nchw->nohw", p["proj_w"].astype(jnp.bfloat16),
                     h.astype(jnp.bfloat16), preferred_element_type=jnp.float32)
    res = res + p["proj_b"].reshape(1, OUT_CH, 1, 1)
    res = res.reshape(B, FUTURE_LEN, len(OUT_LAYERS), H, W)
    last = minimaps[:, HISTORY_LEN - 1, jnp.array(OUT_LAYERS)].astype(jnp.float32)
    return jnp.clip(last[:, None] + jnp.tanh(res), 0.0, 1.0)


# ---------------- run ----------------
if __name__ == "__main__":
    B, H, W = 4, 16, 16
    minimaps = jax.random.uniform(
        jax.random.PRNGKey(0),
        (B, HISTORY_LEN, len(INPUT_LAYER_NAMES), H, W),
        dtype=jnp.float32,
    )
    params = init_params(jax.random.PRNGKey(1))
    aux = build_aux(H, W)

    _roll_is_np_convention()            # resolve pltpu.roll semantics once, eagerly

    out = jax.jit(residule_unet_forward)(minimaps, params, aux)
    out = jax.block_until_ready(out)
    assert out.shape == (B, FUTURE_LEN, len(OUT_LAYERS), H, W), out.shape
    assert bool(jnp.all(jnp.isfinite(out)))

    ref = jax.block_until_ready(jax.jit(reference_forward)(minimaps, params))
    assert ref.shape == out.shape
    # Kernel and XLA reference differ only in where bf16 rounding is applied (subsample /
    # tconv scatter), amplified slightly by the 4-pixel InstanceNorm at the bottleneck.
    max_diff = float(jnp.max(jnp.abs(out - ref)))
    assert max_diff < 4e-2, max_diff

    print("KERNEL_OK")
</pallas_src>

<mosaic_0001>
module attributes {stable_mosaic.version = 11 : i64} {
  func.func @_k(%arg0: memref<8x128xf32, #tpu.memory_space<vmem>>, %arg1: memref<8x128xf32, #tpu.memory_space<vmem>>) attributes {dimension_semantics = [], scalar_prefetch = 0 : i64, scratch_operands = 0 : i64, tpu.core_type = #tpu.core_type<tc>} {
    %c0 = arith.constant 0 : index
    %c0_0 = arith.constant 0 : index
    %0 = vector.load %arg0[%c0, %c0_0] : memref<8x128xf32, #tpu.memory_space<vmem>>, vector<8x128xf32>
    %c1_i32 = arith.constant 1 : i32
    %1 = tpu.dynamic_rotate %0 by %c1_i32 dim 1 : vector<8x128xf32>, i32 -> vector<8x128xf32>
    %c0_1 = arith.constant 0 : index
    %c0_2 = arith.constant 0 : index
    %2 = vector.load %arg1[%c0_1, %c0_2] : memref<8x128xf32, #tpu.memory_space<vmem>>, vector<8x128xf32>
    tpu.vector_store %arg1[%c0_1, %c0_2], %1 {strides = array<i32>} : memref<8x128xf32, #tpu.memory_space<vmem>>, vector<8x128xf32>,
    return
  }
}

</mosaic_0001>

<bundles_post_ra>
// kernel: tpu_custom_call.1
= control target key start
LH: loop header
LB: loop body
LE: loop exit
PB: predicated region body
PF: predicated region fallthrough
CT: control target
= control target key end

     0   :  { %6 = vsyncpa [#allocation3], 0  ;;  %s128_s0 = inlined_call_operand.hbm [shape: f32[8,128], index: 0, kind: input, shape index: {}]   ;;  %s129_s1 = inlined_call_operand.hbm [shape: f32[8,128], index: 1, kind: output, shape index: {}]  }
   0x1   :  { %7 = vsyncpa [#allocation4], 0  ;;  %s91_s6 = smov [#allocation2]   ;;  %s43_s10 = scalar_lea.hbm %s128_s0, 128 }
   0x2   :  { %s14_s7 = sshll.u32 %s91_s6, 4  ;;  %p44_p0 = scmp.ne.s32.totalorder %s128_s0, %s43_s10  ;;  %s15_s7 = int_to_ptr.vmem [resolvable:$true] %s14_s7 }
   0x3   :  { %p47_p1 = scmp.lt.u32.totalorder %s43_s10, %s128_s0 }
   0x5   :  { %p49_p2 = pnand %p47_p1, %p44_p0 }
   0x7   :  { %52 = shalt.err (!%p49_p2)
}
   0x8   :  { %s53_s15 = scalar_lea.vmem %s15_s7, 128  ;;  %p58_p4 = scmp.lt.s32.totalorder %s15_s7, %s15_s7 }
   0x9   :  { %p54_p3 = scmp.ne.s32.totalorder %s15_s7, %s53_s15  ;;  %p59_p5 = scmp.lt.s32.totalorder %s53_s15, %s53_s15 }
   0xb   :  { %p60_p6 = por %p59_p5, %p58_p4 }
   0xd   :  { %p61_p7 = pnand %p60_p6, %p54_p3 }
   0xf   :  { %64 = shalt.err (!%p61_p7)
}
  0x10   :  { %17 = dma.hbm_to_vmem [thread:$0]  %s128_s0, 128, %s15_s7, [#allocation3]  }
  0x11   :  { %87 = dma.done.wait [#allocation3], 128  }
  0x12   :  { %88 = vsyncadd [#allocation3], 4294967168  ;;  %v21_v0 = vld [vmem:[#allocation2] sm:$0xff]  ;;  %s92_s18 = smov 1   ;;  %s93_s19 = smov [#allocation5]  }
  0x13   :  { %22 = vrot.lane.b32.xlu0 %v21_v0, %s92_s18  ;;  %s31_s20 = sshll.u32 %s93_s19, 4  ;;  %s32_s20 = int_to_ptr.vmem [resolvable:$true] %s31_s20 }
  0x14   :  { %s65_s21 = scalar_lea.vmem %s32_s20, 128  ;;  %p70_p9 = scmp.lt.s32.totalorder %s32_s20, %s32_s20 }
  0x15   :  { %p66_p8 = scmp.ne.s32.totalorder %s32_s20, %s65_s21  ;;  %p71_p10 = scmp.lt.s32.totalorder %s65_s21, %s65_s21 }
  0x17   :  { %p72_p11 = por %p71_p10, %p70_p9 }
  0x19   :  { %p73_p12 = pnand %p72_p11, %p66_p8 }
  0x85   :  { %v23_v1 = vpop.permute.xlu0 %22 }
  0x86   :  { %24 = vst [vmem:[#allocation5] sm:$0xff] %v23_v1 }
  0x87   :  { %76 = shalt.err (!%p73_p12)
}
  0x88   :  { %s77_s0 = scalar_lea.hbm %s129_s1, 128 }
  0x89   :  { %p78_p13 = scmp.ne.s32.totalorder %s129_s1, %s77_s0  ;;  %p81_p0 = scmp.lt.u32.totalorder %s77_s0, %s129_s1 }
  0x8b   :  { %p83_p1 = pnand %p81_p0, %p78_p13 }
  0x8d   :  { %86 = shalt.err (!%p83_p1)
}
  0x8e   :  { %34 = dma.vmem_to_hbm [thread:$0]  %s32_s20, 128, %s129_s1, [#allocation4]  }
  0x8f   :  { %89 = dma.done.wait [#allocation4], 128  }
  0x90   :  { %90 = vsyncadd [#allocation4], 4294967168 }
  0x91   :  { %38 = vsyncpa [#allocation3], 1 }
  0x92   :  { %39 = vsyncpa [#allocation4], 1 }

</bundles_post_ra>
